<compile_context>
chip_gen: v6e
topology: v6e:2x2x1
jax: 0.10.0
libtpu: 0.0.40
codegen_flags: <defaults>
</compile_context>

<pallas_src>
import math

import jax
import jax.numpy as jnp
from jax.experimental import pallas as pl
from jax.experimental.pallas import tpu as pltpu


def _network_kernel(x_ref, w1_ref, b1_ref, w3_ref, b3_ref, w3s_ref, b3s_ref,
                    mu_ref, sigma_ref):
    # Fully fused in VMEM: fc1 -> ReLU -> mu head, sigma head.
    x = x_ref[...]                                                     # [Bt, In]
    h = jnp.dot(x, w1_ref[...],
                preferred_element_type=jnp.float32) + b1_ref[...]      # [Bt, H]
    h = jnp.maximum(h, 0.0)                                            # ReLU
    mu = jnp.dot(h, w3_ref[...],
                 preferred_element_type=jnp.float32) + b3_ref[...]     # [Bt, out]
    sg = jnp.dot(h, w3s_ref[...],
                 preferred_element_type=jnp.float32) + b3s_ref[...]    # [Bt, out]
    mu_ref[...] = mu.astype(mu_ref.dtype)
    sigma_ref[...] = sg.astype(sigma_ref.dtype)


def _pick_batch_tile(B, batch_tile):
    """Choose a batch tile.

    - Small B (< 16 rows): single full-array block (tile == B, legal even if
      B is not a multiple of 8 because the block equals the full dim).
    - Otherwise: at least 2 grid steps (so the "parallel" axis can shard
      across both TensorCores on v7x), tile rounded up to a multiple of 8
      (sublane constraint), capped at batch_tile for HBM-streaming tiles.
    """
    if B < 16:
        return B
    half = (pl.cdiv(B, 2) + 7) // 8 * 8   # >= 2 grid steps, sublane-aligned
    return min(batch_tile, half)


def network_forward(x, params, *, batch_tile=1024):
    """Fused Network forward. x: [B, input_dim] float32 -> (mu, sigma)."""
    w1, b1, w3, b3, w3s, b3s = params
    B, in_dim = x.shape
    hid = w1.shape[1]
    out_dim = w3.shape[1]

    tile_b = _pick_batch_tile(B, batch_tile)
    grid = (pl.cdiv(B, tile_b),)   # partial last tile handled by Pallas masking

    # Weights/biases: full-array blocks replicated across grid steps
    # (same block index every iteration -> stay resident in VMEM).
    rep = lambda a: pl.BlockSpec(a.shape, lambda i: (0,) * a.ndim)

    # Advisory cost: this kernel is HBM/overhead bound (a few hundred FLOPs/row).
    flops = 2 * B * (in_dim * hid + 2 * hid * out_dim)
    bytes_accessed = 4 * (B * in_dim                       # x read
                          + in_dim * hid + hid             # fc1 params
                          + 2 * (hid * out_dim + out_dim)  # head params
                          + 2 * B * out_dim)               # mu + sigma writeback
    cost = pl.CostEstimate(flops=flops, transcendentals=0,
                           bytes_accessed=bytes_accessed)

    mu, sigma = pl.pallas_call(
        _network_kernel,
        out_shape=(jax.ShapeDtypeStruct((B, out_dim), jnp.float32),
                   jax.ShapeDtypeStruct((B, out_dim), jnp.float32)),
        grid=grid,
        in_specs=[
            pl.BlockSpec((tile_b, in_dim), lambda i: (i, 0)),  # x: streamed per tile
            rep(w1), rep(b1), rep(w3), rep(b3), rep(w3s), rep(b3s),
        ],
        out_specs=[
            pl.BlockSpec((tile_b, out_dim), lambda i: (i, 0)),  # mu
            pl.BlockSpec((tile_b, out_dim), lambda i: (i, 0)),  # sigma
        ],
        compiler_params=pltpu.CompilerParams(
            dimension_semantics=("parallel",)),   # batch tiles across TCs (v7x)
        cost_estimate=cost,
    )(x, w1, b1, w3, b3, w3s, b3s)

    # NOTE: sigma is the raw linear output, exactly as in the PyTorch forward
    # (no softplus/exp applied there either).
    return mu, sigma


def init_params(key, input_dim, output_dim, hidden_dim):
    """Deterministic init mirroring torch.nn.Linear's default U(-1/sqrt(fan_in), +)."""
    def linear(k, fan_in, fan_out):
        k_w, k_b = jax.random.split(k)
        bound = 1.0 / math.sqrt(fan_in)
        w = jax.random.uniform(k_w, (fan_in, fan_out), jnp.float32, -bound, bound)
        b = jax.random.uniform(k_b, (1, fan_out), jnp.float32, -bound, bound)
        return w, b

    k1, k2, k3 = jax.random.split(key, 3)
    w1, b1 = linear(k1, input_dim, hidden_dim)
    w3, b3 = linear(k2, hidden_dim, output_dim)
    w3s, b3s = linear(k3, hidden_dim, output_dim)
    return (w1, b1, w3, b3, w3s, b3s)


if __name__ == "__main__":
    key = jax.random.PRNGKey(0)
    k_x, k_p, k_b1, k_b2 = jax.random.split(key, 4)

    batch, input_dim, hidden_dim, output_dim = 8, 16, 32, 4

    x = jax.random.normal(k_x, (batch, input_dim), dtype=jnp.float32)
    params = init_params(k_p, input_dim, output_dim, hidden_dim)

    mu, sigma = network_forward(x, params)
    jax.block_until_ready((mu, sigma))

    # Cross-check against plain-JAX reference of the same math.
    w1, b1, w3, b3, w3s, b3s = params

    def ref_fwd(xx):
        h = jnp.maximum(xx @ w1 + b1, 0.0)
        return h @ w3 + b3, h @ w3s + b3s

    mu_ref, sigma_ref = ref_fwd(x)
    assert mu.shape == (batch, output_dim) and sigma.shape == (batch, output_dim)
    assert jnp.allclose(mu, mu_ref, atol=1e-5)
    assert jnp.allclose(sigma, sigma_ref, atol=1e-5)

    # Larger batch exercises the tiled (>=2 grid steps, parallel axis) path.
    xb = jax.random.normal(k_b1, (512, input_dim), dtype=jnp.float32)
    mu_b, sigma_b = network_forward(xb, params)
    jax.block_until_ready((mu_b, sigma_b))
    mu_bref, sigma_bref = ref_fwd(xb)
    assert jnp.allclose(mu_b, mu_bref, atol=1e-5)
    assert jnp.allclose(sigma_b, sigma_bref, atol=1e-5)

    # Non-divisible batch exercises the partial (masked) last tile path.
    xc = jax.random.normal(k_b2, (1000, input_dim), dtype=jnp.float32)
    mu_c, sigma_c = network_forward(xc, params)
    jax.block_until_ready((mu_c, sigma_c))
    mu_cref, sigma_cref = ref_fwd(xc)
    assert jnp.allclose(mu_c, mu_cref, atol=1e-5)
    assert jnp.allclose(sigma_c, sigma_cref, atol=1e-5)

    print("KERNEL_OK")
</pallas_src>

<mosaic_0001>
module attributes {stable_mosaic.version = 11 : i64} {
  func.func @_network_kernel(%arg0: i32, %arg1: memref<8x16xf32, #tpu.memory_space<vmem>>, %arg2: memref<16x32xf32, #tpu.memory_space<vmem>>, %arg3: memref<1x32xf32, #tpu.memory_space<vmem>>, %arg4: memref<32x4xf32, #tpu.memory_space<vmem>>, %arg5: memref<1x4xf32, #tpu.memory_space<vmem>>, %arg6: memref<32x4xf32, #tpu.memory_space<vmem>>, %arg7: memref<1x4xf32, #tpu.memory_space<vmem>>, %arg8: memref<8x4xf32, #tpu.memory_space<vmem>>, %arg9: memref<8x4xf32, #tpu.memory_space<vmem>>) attributes {dimension_semantics = [#tpu.dimension_semantics<parallel>], iteration_bounds = array<i64: 1>, scalar_prefetch = 0 : i64, scratch_operands = 0 : i64, tpu.core_type = #tpu.core_type<tc>, window_params = [{transform_indices = @transform_0, window_bounds = array<i64: 8, 16>}, {pipeline_mode = #tpu.pipeline_mode<synchronous>, transform_indices = @transform_1, window_bounds = array<i64: 16, 32>}, {pipeline_mode = #tpu.pipeline_mode<synchronous>, transform_indices = @transform_2, window_bounds = array<i64: 1, 32>}, {pipeline_mode = #tpu.pipeline_mode<synchronous>, transform_indices = @transform_3, window_bounds = array<i64: 32, 4>}, {pipeline_mode = #tpu.pipeline_mode<synchronous>, transform_indices = @transform_4, window_bounds = array<i64: 1, 4>}, {pipeline_mode = #tpu.pipeline_mode<synchronous>, transform_indices = @transform_5, window_bounds = array<i64: 32, 4>}, {pipeline_mode = #tpu.pipeline_mode<synchronous>, transform_indices = @transform_6, window_bounds = array<i64: 1, 4>}, {transform_indices = @transform_7, window_bounds = array<i64: 8, 4>}, {transform_indices = @transform_8, window_bounds = array<i64: 8, 4>}]} {
    %c0 = arith.constant 0 : index
    %c0_0 = arith.constant 0 : index
    %0 = vector.load %arg1[%c0, %c0_0] : memref<8x16xf32, #tpu.memory_space<vmem>>, vector<8x16xf32>
    %c0_1 = arith.constant 0 : index
    %c0_2 = arith.constant 0 : index
    %1 = vector.load %arg2[%c0_1, %c0_2] : memref<16x32xf32, #tpu.memory_space<vmem>>, vector<16x32xf32>
    %cst = arith.constant dense<0.000000e+00> : vector<8x32xf32>
    %2 = tpu.matmul %0, %1, %cst {dimension_numbers = #tpu.dot_dimension_numbers<[1], [0], [0], [1], [0, 0, 1, 1], [], []>} : vector<8x16xf32>, vector<16x32xf32>, vector<8x32xf32> -> vector<8x32xf32>
    %c0_3 = arith.constant 0 : index
    %c0_4 = arith.constant 0 : index
    %3 = vector.load %arg3[%c0_3, %c0_4] : memref<1x32xf32, #tpu.memory_space<vmem>>, vector<1x32xf32>
    %4 = vector.broadcast %3 : vector<1x32xf32> to vector<8x32xf32>
    %5 = arith.addf %2, %4 : vector<8x32xf32>
    %cst_5 = arith.constant 0.000000e+00 : f32
    %6 = vector.broadcast %cst_5 : f32 to vector<8x32xf32>
    %7 = arith.maximumf %5, %6 : vector<8x32xf32>
    %c0_6 = arith.constant 0 : index
    %c0_7 = arith.constant 0 : index
    %8 = vector.load %arg4[%c0_6, %c0_7] : memref<32x4xf32, #tpu.memory_space<vmem>>, vector<32x4xf32>
    %cst_8 = arith.constant dense<0.000000e+00> : vector<8x4xf32>
    %9 = tpu.matmul %7, %8, %cst_8 {dimension_numbers = #tpu.dot_dimension_numbers<[1], [0], [0], [1], [0, 0, 1, 1], [], []>} : vector<8x32xf32>, vector<32x4xf32>, vector<8x4xf32> -> vector<8x4xf32>
    %c0_9 = arith.constant 0 : index
    %c0_10 = arith.constant 0 : index
    %10 = vector.load %arg5[%c0_9, %c0_10] : memref<1x4xf32, #tpu.memory_space<vmem>>, vector<1x4xf32>
    %11 = vector.broadcast %10 : vector<1x4xf32> to vector<8x4xf32>
    %12 = arith.addf %9, %11 : vector<8x4xf32>
    %c0_11 = arith.constant 0 : index
    %c0_12 = arith.constant 0 : index
    %13 = vector.load %arg6[%c0_11, %c0_12] : memref<32x4xf32, #tpu.memory_space<vmem>>, vector<32x4xf32>
    %cst_13 = arith.constant dense<0.000000e+00> : vector<8x4xf32>
    %14 = tpu.matmul %7, %13, %cst_13 {dimension_numbers = #tpu.dot_dimension_numbers<[1], [0], [0], [1], [0, 0, 1, 1], [], []>} : vector<8x32xf32>, vector<32x4xf32>, vector<8x4xf32> -> vector<8x4xf32>
    %c0_14 = arith.constant 0 : index
    %c0_15 = arith.constant 0 : index
    %15 = vector.load %arg7[%c0_14, %c0_15] : memref<1x4xf32, #tpu.memory_space<vmem>>, vector<1x4xf32>
    %16 = vector.broadcast %15 : vector<1x4xf32> to vector<8x4xf32>
    %17 = arith.addf %14, %16 : vector<8x4xf32>
    %c0_16 = arith.constant 0 : index
    %c0_17 = arith.constant 0 : index
    %18 = vector.load %arg8[%c0_16, %c0_17] : memref<8x4xf32, #tpu.memory_space<vmem>>, vector<8x4xf32>
    tpu.vector_store %arg8[%c0_16, %c0_17], %12 {strides = array<i32>} : memref<8x4xf32, #tpu.memory_space<vmem>>, vector<8x4xf32>,
    %c0_18 = arith.constant 0 : index
    %c0_19 = arith.constant 0 : index
    %19 = vector.load %arg9[%c0_18, %c0_19] : memref<8x4xf32, #tpu.memory_space<vmem>>, vector<8x4xf32>
    tpu.vector_store %arg9[%c0_18, %c0_19], %17 {strides = array<i32>} : memref<8x4xf32, #tpu.memory_space<vmem>>, vector<8x4xf32>,
    return
  }
  func.func @transform_0(%arg0: i32) -> (i32, i32) {
    %c0_i32 = arith.constant 0 : i32
    %c0_i32_0 = arith.constant 0 : i32
    return %arg0, %c0_i32 : i32, i32
  }
  func.func @transform_1(%arg0: i32) -> (i32, i32) {
    %c0_i32 = arith.constant 0 : i32
    %c0_i32_0 = arith.constant 0 : i32
    %c0_i32_1 = arith.constant 0 : i32
    return %c0_i32, %c0_i32_0 : i32, i32
  }
  func.func @transform_2(%arg0: i32) -> (i32, i32) {
    %c0_i32 = arith.constant 0 : i32
    %c0_i32_0 = arith.constant 0 : i32
    %c0_i32_1 = arith.constant 0 : i32
    return %c0_i32, %c0_i32_0 : i32, i32
  }
  func.func @transform_3(%arg0: i32) -> (i32, i32) {
    %c0_i32 = arith.constant 0 : i32
    %c0_i32_0 = arith.constant 0 : i32
    %c0_i32_1 = arith.constant 0 : i32
    return %c0_i32, %c0_i32_0 : i32, i32
  }
  func.func @transform_4(%arg0: i32) -> (i32, i32) {
    %c0_i32 = arith.constant 0 : i32
    %c0_i32_0 = arith.constant 0 : i32
    %c0_i32_1 = arith.constant 0 : i32
    return %c0_i32, %c0_i32_0 : i32, i32
  }
  func.func @transform_5(%arg0: i32) -> (i32, i32) {
    %c0_i32 = arith.constant 0 : i32
    %c0_i32_0 = arith.constant 0 : i32
    %c0_i32_1 = arith.constant 0 : i32
    return %c0_i32, %c0_i32_0 : i32, i32
  }
  func.func @transform_6(%arg0: i32) -> (i32, i32) {
    %c0_i32 = arith.constant 0 : i32
    %c0_i32_0 = arith.constant 0 : i32
    %c0_i32_1 = arith.constant 0 : i32
    return %c0_i32, %c0_i32_0 : i32, i32
  }
  func.func @transform_7(%arg0: i32) -> (i32, i32) {
    %c0_i32 = arith.constant 0 : i32
    %c0_i32_0 = arith.constant 0 : i32
    return %arg0, %c0_i32 : i32, i32
  }
  func.func @transform_8(%arg0: i32) -> (i32, i32) {
    %c0_i32 = arith.constant 0 : i32
    %c0_i32_0 = arith.constant 0 : i32
    return %arg0, %c0_i32 : i32, i32
  }
}

</mosaic_0001>

<bundles_post_ra>
// kernel: tpu_custom_call.1
= control target key start
LH: loop header
LB: loop body
LE: loop exit
PB: predicated region body
PF: predicated region fallthrough
CT: control target
= control target key end

     0   :  { %v340_v0 = vmov 0.0   ;;  %vm341_vm0 = vmmov 0   ;;  %vm38_vm1 = vcmask 130048   ;;  %vm124_vm2 = vcmask 261120   ;;  %s438_s1 = inlined_call_operand.vmem [shape: f32[16,32], index: 1, kind: input, shape index: {}]   ;;  %s439_s0 = inlined_call_operand.vmem [shape: f32[8,16], index: 0, kind: input, shape index: {}]   ;;  %s440_s3 = inlined_call_operand.vmem [shape: f32[32,4], index: 3, kind: input, shape index: {}]   ;;  %s441_s5 = inlined_call_operand.vmem [shape: f32[32,4], index: 5, kind: input, shape index: {}]   ;;  %s442_s2 = inlined_call_operand.vmem [shape: f32[1,32], index: 2, kind: input, shape index: {}]   ;;  %s443_s4 = inlined_call_operand.vmem [shape: f32[1,4], index: 4, kind: input, shape index: {}]   ;;  %s444_s6 = inlined_call_operand.vmem [shape: f32[1,4], index: 6, kind: input, shape index: {}]   ;;  %s445_s7 = inlined_call_operand.vmem [shape: f32[8,4], index: 7, kind: output, shape index: {0}]   ;;  %s446_s8 = inlined_call_operand.vmem [shape: f32[8,4], index: 8, kind: output, shape index: {1}]  }
   0x1   :  { %309 = vmatprep.subr.mxu0 %v340_v0  ;;  %v30_v1 = vld [vmem:[%s438_s1 + $0x8] sm:$0xff]  ;;  %v29_v2 = vld [vmem:[%s438_s1] sm:$0xff]  ;;  %313 = vmatprep.mubr.msk.f32.mxu0 %vm341_vm0, %v340_v0  ;;  %v116_v4 = vld [vmem:[%s440_s3 + $0x18] sm:$0xff]  ;;  %vm279_vm3 = vcmask 31744  }
   0x2   :  { %310 = vmatpush3.msra.mxu0 %v30_v1  ;;  %v28_v3 = vld [vmem:[%s439_s0] sm:$0xff]  ;;  %316 = vmatprep.subr.mxu1 %v340_v0  ;;  %v201_v5 = vld [vmem:[%s441_s5 + $0x18] sm:$0xff]  ;;  %v115_v6 = vld [vmem:[%s440_s3 + $0x10] sm:$0xff] }
   0x3   :  { %311 = vmatprep.subr.mxu0 %v340_v0  ;;  %317 = vmatpush3.msra.mxu1 %v116_v4  ;;  %v200_v7 = vld [vmem:[%s441_s5 + $0x10] sm:$0xff]  ;;  %v114_v8 = vld [vmem:[%s440_s3 + $0x8] sm:$0xff]  ;;  %v113_v10 = vld [vmem:[%s440_s3] sm:$0xff] }
   0x4   :  { %312 = vmatpush3.msra.mxu0 %v29_v2  ;;  %318 = vmatprep.subr.mxu1 %v340_v0  ;;  %v199_v9 = vld [vmem:[%s441_s5 + $0x8] sm:$0xff]  ;;  %v198_v11 = vld [vmem:[%s441_s5] sm:$0xff] }
   0x5   :  { %314 = vmatmul.mubr.msk.f32.vlgmr.msra.gmra.mxu0 %vm38_vm1, %v28_v3  ;;  %327 = vmatprep.subr.mxu0 %v340_v0  ;;  %v290_v12 = vld [vmem:[%s442_s2] ss:$0 sm:$0xff] }
   0x6   :  { %328 = vmatpush3.msra.mxu0 %v201_v5  ;;  %324 = vmatprep.mubr.msk.f32.mxu1 %vm341_vm0, %v340_v0  ;;  %v292_v17 = vld [vmem:[%s443_s4] ss:$0 sm:$0xff] }
   0x7   :  { %329 = vmatprep.subr.mxu0 %v340_v0  ;;  %335 = vmatprep.mubr.msk.f32.mxu0 %vm341_vm0, %v340_v0  ;;  %v294_v18 = vld [vmem:[%s444_s6] ss:$0 sm:$0xff] }
   0x8   :  { %319 = vmatpush3.msra.mxu1 %v115_v6  ;;  %330 = vmatpush3.msra.mxu0 %v200_v7 }
   0x9   :  { %320 = vmatprep.subr.mxu1 %v340_v0  ;;  %331 = vmatprep.subr.mxu0 %v340_v0 }
   0xa   :  { %321 = vmatpush3.msra.mxu1 %v114_v8  ;;  %332 = vmatpush3.msra.mxu0 %v199_v9 }
   0xb   :  { %322 = vmatprep.subr.mxu1 %v340_v0  ;;  %333 = vmatprep.subr.mxu0 %v340_v0 }
   0xc   :  { %323 = vmatpush3.msra.mxu1 %v113_v10  ;;  %334 = vmatpush3.msra.mxu0 %v198_v11 }
  0xc5   :  { %v108_v13 = vpop.f32.mrf.mxu0 }
  0xc6   :  { %v109_v14 = vadd.f32 %v290_v12, %v108_v13 }
  0xc7   :  { %v315_v15 = vpop.f32.mrf.mxu0 }
  0xc8   :  { %v112_v16 = vmax.f32 %v109_v14, 0.0 }
  0xca   :  { %325 = vmatmul.mubr.msk.f32.vlgmr.msra.gmra.mxu1 %vm124_vm2, %v112_v16  ;;  %336 = vmatmul.mubr.msk.f32.vlgmr.msra.gmra.mxu0 %vm124_vm2, %v112_v16 }
 0x18a   :  { %v194_v19 = vpop.f32.mrf.mxu1  ;;  %v275_v20 = vpop.f32.mrf.mxu0 }
 0x18b   :  { %v195_v21 = vadd.f32 %v292_v17, %v194_v19  ;;  %v276_v22 = vadd.f32 %v294_v18, %v275_v20 }
 0x18c   :  { %v326_v23 = vpop.f32.mrf.mxu1  ;;  %v337_v24 = vpop.f32.mrf.mxu0 }
 0x18d   :  { %280 = vst.msk [vmem:[%s445_s7] sm:$0xff] %vm279_vm3, %v195_v21  ;;  %281 = vst.msk [vmem:[%s446_s8] sm:$0xff] %vm279_vm3, %v276_v22 }

</bundles_post_ra>
